<compile_context>
chip_gen: v7x
topology: tpu7x:2x2x1
jax: 0.10.0
libtpu: 0.0.40
codegen_flags: <defaults>
</compile_context>

<pallas_src>
import functools
import math

import numpy as np
import jax
import jax.numpy as jnp
from jax.experimental import pallas as pl
from jax.experimental.pallas import tpu as pltpu

KEYDIM = 128
VALDIM = 512
MDIM = 256


def _round_up(x, m):
    return ((x + m - 1) // m) * m


def _choose_tk(k_pad, tk_max=2048):
    """Largest K-tile that is a multiple of 128, divides k_pad and is <= tk_max."""
    if k_pad <= tk_max:
        return k_pad
    for cand in range(tk_max, 0, -128):
        if k_pad % cand == 0:
            return cand
    return 128


# -----------------------------------------------------------------------------
# Pallas kernel 1: tiled matmul with fused bias / ReLU / residual epilogue.
# Used for every convolution (via K-folded im2col) in the network.
# -----------------------------------------------------------------------------
def _mm_kernel(*refs, relu_in, relu_out, has_res):
    if has_res:
        a_ref, w_ref, b_ref, res_ref, o_ref, acc_ref = refs
    else:
        a_ref, w_ref, b_ref, o_ref, acc_ref = refs
        res_ref = None
    k = pl.program_id(2)

    @pl.when(k == 0)
    def _():
        acc_ref[...] = jnp.zeros_like(acc_ref)

    a = a_ref[...]
    if relu_in:
        # keep the vector math in f32 (v5e VPU has no bf16), feed the MXU bf16
        a = jnp.maximum(a.astype(jnp.float32), 0.0).astype(jnp.bfloat16)
    acc_ref[...] += jnp.dot(a, w_ref[...], preferred_element_type=jnp.float32)

    @pl.when(k == pl.num_programs(2) - 1)
    def _():
        r = acc_ref[...] + b_ref[...]
        if has_res:
            r = r + res_ref[...].astype(jnp.float32)
        if relu_out:
            r = jnp.maximum(r, 0.0)
        o_ref[...] = r.astype(o_ref.dtype)


def matmul_fused(a, w, b=None, relu_in=False, relu_out=False, residual=None,
                 out_dtype=jnp.bfloat16, tm_default=256):
    """a: (M, K), w: (K, N), b: (N,) or None, residual: (M, N) or None."""
    M, K = a.shape
    N = w.shape[1]
    a = a.astype(jnp.bfloat16)
    w = w.astype(jnp.bfloat16)
    if b is None:
        b = jnp.zeros((N,), jnp.float32)
    b = b.astype(jnp.float32)

    K_pad = _round_up(K, 128)
    N_pad = _round_up(N, 128)
    if M >= tm_default:
        tm = tm_default
        M_pad = _round_up(M, tm)
    else:
        tm = _round_up(M, 8)
        M_pad = tm
    tn = 256 if N_pad % 256 == 0 else 128
    tk = _choose_tk(K_pad)

    a_p = jnp.pad(a, ((0, M_pad - M), (0, K_pad - K)))
    w_p = jnp.pad(w, ((0, K_pad - K), (0, N_pad - N)))
    b_p = jnp.pad(b, ((0, N_pad - N),)).reshape(1, N_pad)

    has_res = residual is not None
    inputs = [a_p, w_p, b_p]
    in_specs = [
        pl.BlockSpec((tm, tk), lambda m, n, k: (m, k)),
        pl.BlockSpec((tk, tn), lambda m, n, k: (k, n)),
        pl.BlockSpec((1, tn), lambda m, n, k: (0, n)),
    ]
    if has_res:
        r_p = jnp.pad(residual.astype(jnp.bfloat16),
                      ((0, M_pad - M), (0, N_pad - N)))
        inputs.append(r_p)
        in_specs.append(pl.BlockSpec((tm, tn), lambda m, n, k: (m, n)))

    grid = (M_pad // tm, N_pad // tn, K_pad // tk)
    kern = functools.partial(_mm_kernel, relu_in=relu_in, relu_out=relu_out,
                             has_res=has_res)
    out = pl.pallas_call(
        kern,
        out_shape=jax.ShapeDtypeStruct((M_pad, N_pad), out_dtype),
        grid=grid,
        in_specs=in_specs,
        out_specs=pl.BlockSpec((tm, tn), lambda m, n, k: (m, n)),
        scratch_shapes=[pltpu.VMEM((tm, tn), jnp.float32)],
        compiler_params=pltpu.CompilerParams(
            dimension_semantics=("parallel", "parallel", "arbitrary"),
            vmem_limit_bytes=32 * 1024 * 1024),
    )(*inputs)
    return out[:M, :N]


# -----------------------------------------------------------------------------
# Conv2d (NHWC) via K-folded im2col (1x1 convs are pure reshapes) + fused matmul
# -----------------------------------------------------------------------------
def conv2d_nhwc(x, w, b=None, stride=1, padding=0, relu_in=False, relu_out=False,
                residual=None, out_dtype=jnp.bfloat16):
    """x: (N,H,W,Cin) ; w: (Cout,Cin,Kh,Kw) PyTorch layout ; returns (N,Ho,Wo,Cout)."""
    N, H, W_, Cin = x.shape
    Cout, _, Kh, Kw = w.shape
    Ho = (H + 2 * padding - Kh) // stride + 1
    Wo = (W_ + 2 * padding - Kw) // stride + 1

    if Kh == 1 and Kw == 1 and padding == 0:
        xs = x if stride == 1 else x[:, ::stride, ::stride, :]
        a = xs.reshape(N * Ho * Wo, Cin)
    else:
        xp = x
        if padding > 0:
            xp = jnp.pad(x, ((0, 0), (padding, padding), (padding, padding), (0, 0)))
        cols = []
        for kh in range(Kh):
            for kw in range(Kw):
                cols.append(xp[:, kh:kh + stride * (Ho - 1) + 1:stride,
                               kw:kw + stride * (Wo - 1) + 1:stride, :])
        a = jnp.concatenate(cols, axis=-1).reshape(N * Ho * Wo, Kh * Kw * Cin)

    wt = jnp.transpose(w, (2, 3, 1, 0)).reshape(Kh * Kw * Cin, Cout)
    res = None if residual is None else residual.reshape(N * Ho * Wo, Cout)
    out = matmul_fused(a, wt, b, relu_in=relu_in, relu_out=relu_out,
                       residual=res, out_dtype=out_dtype)
    return out.reshape(N, Ho, Wo, Cout)


def fold_bn_conv(w, b, bn, eps=1e-5):
    """Fold eval-mode BatchNorm into conv weight / bias (done in f32)."""
    scale = bn["gamma"] / jnp.sqrt(bn["var"] + eps)
    w_f = w * scale[:, None, None, None]
    b0 = jnp.zeros_like(bn["beta"]) if b is None else b
    b_f = (b0 - bn["mean"]) * scale + bn["beta"]
    return w_f, b_f


# -----------------------------------------------------------------------------
# Pallas kernel 2: Memory read (scores -> softmax over centers -> weighted sum)
# -----------------------------------------------------------------------------
def _memory_kernel(mk_ref, mv_ref, q_ref, o_ref, *, c_dim):
    q = q_ref[0]                                             # (HW, C)   bf16
    mk = mk_ref[0]                                           # (T, C)    bf16
    s = jax.lax.dot_general(q, mk, (((1,), (1,)), ((), ())),
                            preferred_element_type=jnp.float32)   # (HW, T)
    s = s * (1.0 / math.sqrt(c_dim))
    s = s - jnp.max(s, axis=-1, keepdims=True)
    e = jnp.exp(s)
    p = e * pl.reciprocal(jnp.sum(e, axis=-1, keepdims=True), approx=True)
    mem = jnp.dot(p.astype(mv_ref.dtype), mv_ref[0],
                  preferred_element_type=jnp.float32)             # (HW, vd)
    o_ref[0] = mem.astype(o_ref.dtype)


def memory_read(keys, values, qi):
    """keys: (no,T,C), values: (no,T,vd), qi: (no,HW,C) -> mem: (no,HW,vd)."""
    no, T, C = keys.shape
    vd = values.shape[2]
    HW = qi.shape[1]
    kern = functools.partial(_memory_kernel, c_dim=C)
    return pl.pallas_call(
        kern,
        out_shape=jax.ShapeDtypeStruct((no, HW, vd), jnp.bfloat16),
        grid=(no,),
        in_specs=[
            pl.BlockSpec((1, T, C), lambda i: (i, 0, 0)),
            pl.BlockSpec((1, T, vd), lambda i: (i, 0, 0)),
            pl.BlockSpec((1, HW, C), lambda i: (i, 0, 0)),
        ],
        out_specs=pl.BlockSpec((1, HW, vd), lambda i: (i, 0, 0)),
        compiler_params=pltpu.CompilerParams(
            dimension_semantics=("parallel",)),
    )(keys.astype(jnp.bfloat16), values.astype(jnp.bfloat16),
      qi.astype(jnp.bfloat16))


# -----------------------------------------------------------------------------
# Pallas kernel 3: 2-class softmax + Soft_aggregation head (lane-dense, H*W)
# -----------------------------------------------------------------------------
def _head_kernel(d_ref, logit_ref, ps_ref):
    d = d_ref[...].astype(jnp.float32)            # (1, HW)  class1 - class0 logit
    ps = 1.0 / (1.0 + jnp.exp(-d))                # == softmax([p0,p1])[1]
    eps = 1e-07
    em1 = jnp.clip(ps, eps, 1.0 - eps)
    em0 = jnp.clip(1.0 - ps, eps, 1.0 - eps)
    l0 = jnp.log(em0 / (1.0 - em0))
    l1 = jnp.log(em1 / (1.0 - em1))
    logit_ref[...] = jnp.concatenate([l0, l1], axis=0)
    ps_ref[...] = ps


def soft_agg_head(d_hw):
    """d_hw: (H, W) class-difference logit -> logit (1,2,H,W), ps (1,H,W)."""
    H, W = d_hw.shape
    HW = H * W
    d = d_hw.reshape(1, HW).astype(jnp.float32)
    logit, ps = pl.pallas_call(
        _head_kernel,
        out_shape=(jax.ShapeDtypeStruct((2, HW), jnp.float32),
                   jax.ShapeDtypeStruct((1, HW), jnp.float32)),
        grid=(1,),
        in_specs=[pl.BlockSpec((1, HW), lambda i: (0, 0))],
        out_specs=(pl.BlockSpec((2, HW), lambda i: (0, 0)),
                   pl.BlockSpec((1, HW), lambda i: (0, 0))),
    )(d)
    return logit.reshape(1, 2, H, W), ps.reshape(1, H, W)


# -----------------------------------------------------------------------------
# Glue: maxpool, nearest / bilinear interpolation (elementwise, memory-bound)
# -----------------------------------------------------------------------------
def maxpool_3x3_s2_p1_nhwc(x):
    N, H, W, C = x.shape
    Ho = (H + 2 - 3) // 2 + 1
    Wo = (W + 2 - 3) // 2 + 1
    xp = jnp.pad(x, ((0, 0), (1, 1), (1, 1), (0, 0)),
                 constant_values=float("-inf"))
    out = None
    for kh in range(3):
        for kw in range(3):
            v = xp[:, kh:kh + 2 * (Ho - 1) + 1:2, kw:kw + 2 * (Wo - 1) + 1:2, :]
            out = v if out is None else jnp.maximum(out, v)
    return out


def nearest_resize_hw(x, out_h, out_w):
    H, W = x.shape[-2], x.shape[-1]
    hi = np.floor(np.arange(out_h) * (H / out_h)).astype(np.int32)
    wi = np.floor(np.arange(out_w) * (W / out_w)).astype(np.int32)
    return x[..., hi, :][..., :, wi]


def bilinear_resize_nhwc(x, out_h, out_w):
    """PyTorch F.interpolate(mode='bilinear', align_corners=False) on NHWC."""
    N, H, W, C = x.shape
    if (H, W) == (out_h, out_w):
        return x.astype(jnp.float32)

    def coords(in_size, out_size):
        scale = in_size / out_size
        src = np.maximum((np.arange(out_size, dtype=np.float64) + 0.5) * scale - 0.5, 0.0)
        i0 = np.clip(np.floor(src).astype(np.int32), 0, in_size - 1)
        i1 = np.minimum(i0 + 1, in_size - 1)
        frac = (src - i0).astype(np.float32)
        return i0, i1, jnp.asarray(frac)

    h0, h1, hf = coords(H, out_h)
    w0, w1, wf = coords(W, out_w)
    xf = x.astype(jnp.float32)
    top = xf[:, h0]
    bot = xf[:, h1]
    hf_ = hf[None, :, None, None]
    rows = top * (1.0 - hf_) + bot * hf_
    left = rows[:, :, w0]
    right = rows[:, :, w1]
    wf_ = wf[None, None, :, None]
    return left * (1.0 - wf_) + right * wf_


# -----------------------------------------------------------------------------
# Parameter construction (deterministic synthetic init)
# -----------------------------------------------------------------------------
class ParamGen:
    def __init__(self, key):
        self.key = key

    def _next(self):
        self.key, sub = jax.random.split(self.key)
        return sub

    def convw(self, cout, cin, kh, kw):
        fan_in = cin * kh * kw
        return jax.random.normal(self._next(), (cout, cin, kh, kw), jnp.float32) / np.sqrt(fan_in)

    def conv(self, cout, cin, kh, kw):
        return {"w": self.convw(cout, cin, kh, kw),
                "b": 0.01 * jax.random.normal(self._next(), (cout,), jnp.float32)}

    def bn(self, c):
        return {"gamma": jnp.ones((c,), jnp.float32), "beta": jnp.zeros((c,), jnp.float32),
                "mean": jnp.zeros((c,), jnp.float32), "var": jnp.ones((c,), jnp.float32)}


def _make_layer(pg, inplanes, planes, blocks, stride):
    layer = []
    for i in range(blocks):
        s = stride if i == 0 else 1
        inp = inplanes if i == 0 else planes * 4
        blk = {"conv1": pg.convw(planes, inp, 1, 1), "bn1": pg.bn(planes),
               "conv2": pg.convw(planes, planes, 3, 3), "bn2": pg.bn(planes),
               "conv3": pg.convw(planes * 4, planes, 1, 1), "bn3": pg.bn(planes * 4),
               "stride": s}
        if s != 1 or inp != planes * 4:
            blk["down"] = pg.convw(planes * 4, inp, 1, 1)
            blk["down_bn"] = pg.bn(planes * 4)
        layer.append(blk)
    return layer


def _resnet_backbone(pg):
    # TODO(synk): pretrained torchvision resnet50 weights replaced by synthetic init.
    return {"conv1": pg.convw(64, 3, 7, 7), "bn1": pg.bn(64),
            "layer1": _make_layer(pg, 64, 64, 3, 1),
            "layer2": _make_layer(pg, 256, 128, 4, 2),
            "layer3": _make_layer(pg, 512, 256, 6, 2)}


def init_amb_params(key, keydim=KEYDIM, valdim=VALDIM, mdim=MDIM):
    pg = ParamGen(key)
    enc_m = _resnet_backbone(pg)
    enc_m["conv1_m"] = pg.convw(64, 1, 7, 7)
    enc_m["conv1_o"] = pg.convw(64, 1, 7, 7)
    enc_q = _resnet_backbone(pg)
    kv = lambda: {"key": pg.conv(keydim, 1024, 3, 3), "val": pg.conv(valdim, 1024, 3, 3)}
    resb = lambda d: {"conv1": pg.conv(d, d, 3, 3), "conv2": pg.conv(d, d, 3, 3)}
    refine = lambda inp, pls: {"convFS": pg.conv(pls, inp, 3, 3), "ResFS": resb(pls), "ResMM": resb(pls)}
    dec = {"convFM": pg.conv(mdim, 2 * valdim, 3, 3), "ResMM": resb(mdim),
           "RF3": refine(512, mdim), "RF2": refine(256, mdim),
           "pred2": pg.conv(2, mdim, 3, 3)}
    return {"enc_m": enc_m, "enc_q": enc_q, "kv_m": kv(), "kv_q": kv(), "dec": dec,
            "keydim": keydim, "valdim": valdim}


# -----------------------------------------------------------------------------
# Network forward (NHWC, BN folded, residual/ReLU fused into conv epilogues)
# -----------------------------------------------------------------------------
def bottleneck_fwd(p, x):
    w1, b1 = fold_bn_conv(p["conv1"], None, p["bn1"])
    out = conv2d_nhwc(x, w1, b1, 1, 0, relu_out=True)
    w2, b2 = fold_bn_conv(p["conv2"], None, p["bn2"])
    out = conv2d_nhwc(out, w2, b2, p["stride"], 1, relu_out=True)
    if "down" in p:
        wd, bd = fold_bn_conv(p["down"], None, p["down_bn"])
        identity = conv2d_nhwc(x, wd, bd, p["stride"], 0)
    else:
        identity = x
    w3, b3 = fold_bn_conv(p["conv3"], None, p["bn3"])
    return conv2d_nhwc(out, w3, b3, 1, 0, residual=identity, relu_out=True)


def run_layer(blocks, x):
    for blk in blocks:
        x = bottleneck_fwd(blk, x)
    return x


def _backbone_tail(p, c1):
    x = maxpool_3x3_s2_p1_nhwc(c1)
    r2 = run_layer(p["layer1"], x)
    r3 = run_layer(p["layer2"], r2)
    r4 = run_layer(p["layer3"], r3)
    return r4, r3, r2, c1


def encoder_q_fwd(p, f_nhwc):
    w, b = fold_bn_conv(p["conv1"], None, p["bn1"])
    c1 = conv2d_nhwc(f_nhwc, w, b, stride=2, padding=3, relu_out=True)
    return _backbone_tail(p, c1)


def encoder_m_fwd(p, f_nhwc, m_hw, bg_hw):
    # conv1(f) + conv1_m(m) + conv1_o(bg) == one conv on the 5-channel concat
    x_in = jnp.concatenate([f_nhwc, m_hw[..., None], bg_hw[..., None]], axis=-1)
    w_cat = jnp.concatenate([p["conv1"], p["conv1_m"], p["conv1_o"]], axis=1)
    w, b = fold_bn_conv(w_cat, None, p["bn1"])
    c1 = conv2d_nhwc(x_in, w, b, stride=2, padding=3, relu_out=True)
    return _backbone_tail(p, c1)


def resblock_fwd(p, x):
    r = conv2d_nhwc(x, p["conv1"]["w"], p["conv1"]["b"], 1, 1, relu_in=True)
    return conv2d_nhwc(r, p["conv2"]["w"], p["conv2"]["b"], 1, 1,
                       relu_in=True, residual=x)


def refine_fwd(p, f, pm):
    s = resblock_fwd(p["ResFS"], conv2d_nhwc(f, p["convFS"]["w"], p["convFS"]["b"], 1, 1))
    up = bilinear_resize_nhwc(pm, s.shape[1], s.shape[2]).astype(s.dtype)
    return resblock_fwd(p["ResMM"], s + up)


def decoder_fwd(p, m4_in, r3, r2, frame_hw, test_dist):
    m4 = resblock_fwd(p["ResMM"], conv2d_nhwc(m4_in, p["convFM"]["w"], p["convFM"]["b"], 1, 1))
    if test_dist is not None:
        dist = test_dist / test_dist.shape[-1]
        dist = nearest_resize_hw(dist, m4.shape[1], m4.shape[2])      # (1, h4, w4)
        m4 = m4 + dist[..., None].astype(m4.dtype)
    m3 = refine_fwd(p["RF3"], r3, m4)
    m2 = refine_fwd(p["RF2"], r2, m3)
    # pred2 (Cout=2) collapsed to class1-class0 logit difference (exact under
    # the downstream 2-class softmax); keeps the store path lane-dense.
    wd = p["pred2"]["w"][1:2] - p["pred2"]["w"][0:1]
    bd = p["pred2"]["b"][1:2] - p["pred2"]["b"][0:1]
    d = conv2d_nhwc(m2, wd, bd, 1, 1, relu_in=True, out_dtype=jnp.float32)
    H, W = frame_hw
    d_up = bilinear_resize_nhwc(d, H, W)                              # (1,H,W,1) f32
    return d_up[0, :, :, 0]


def memorize(params, frame, masks, num_objects=1):
    keydim, valdim = params["keydim"], params["valdim"]
    f = jnp.transpose(frame, (0, 2, 3, 1)).astype(jnp.bfloat16)       # NCHW -> NHWC
    frame_batch = jnp.concatenate([f] * num_objects, axis=0)
    mask_batch = jnp.concatenate([masks[:, o] for o in range(1, num_objects + 1)], axis=0)
    bg_batch = jnp.concatenate([jnp.clip(1.0 - masks[:, o], 0.0, 1.0)
                                for o in range(1, num_objects + 1)], axis=0)
    r4, _, _, _ = encoder_m_fwd(params["enc_m"], frame_batch,
                                mask_batch.astype(jnp.bfloat16),
                                bg_batch.astype(jnp.bfloat16))
    k4 = conv2d_nhwc(r4, params["kv_m"]["key"]["w"], params["kv_m"]["key"]["b"], 1, 1)
    v4 = conv2d_nhwc(r4, params["kv_m"]["val"]["w"], params["kv_m"]["val"]["b"], 1, 1)
    k4 = k4.reshape(num_objects, -1, keydim).astype(jnp.float32)      # == permute(0,2,3,1).view
    v4 = v4.reshape(num_objects, -1, valdim).astype(jnp.float32)
    r4_nchw = jnp.transpose(r4, (0, 3, 1, 2)).astype(jnp.float32)
    return k4, v4, r4_nchw


def segment(params, frame, keys, values, test_dist=None):
    num_objects = 1  # hardcoded in the reference segment(), as is max_obj = 1
    keydim, valdim = params["keydim"], params["valdim"]
    f = jnp.transpose(frame, (0, 2, 3, 1)).astype(jnp.bfloat16)
    r4, r3, r2, _ = encoder_q_fwd(params["enc_q"], f)
    k4 = conv2d_nhwc(r4, params["kv_q"]["key"]["w"], params["kv_q"]["key"]["b"], 1, 1)
    v4 = conv2d_nhwc(r4, params["kv_q"]["val"]["w"], params["kv_q"]["val"]["b"], 1, 1)
    _, h4, w4, _ = k4.shape
    k4e = jnp.broadcast_to(k4, (num_objects,) + k4.shape[1:])
    v4e = jnp.broadcast_to(v4, (num_objects,) + v4.shape[1:])
    r3e = jnp.broadcast_to(r3, (num_objects,) + r3.shape[1:])
    r2e = jnp.broadcast_to(r2, (num_objects,) + r2.shape[1:])
    qi = k4e.reshape(num_objects, h4 * w4, keydim)
    mem = memory_read(keys, values, qi).reshape(num_objects, h4, w4, valdim)
    m4 = jnp.concatenate([mem, v4e], axis=-1)                         # (no,h4,w4,2*valdim)
    d = decoder_fwd(params["dec"], m4, r3e, r2e,
                    (frame.shape[2], frame.shape[3]), test_dist)
    logit, ps = soft_agg_head(d)
    return logit, ps


def amb_forward(params, frame, mask=None, keys=None, values=None,
                num_objects=1, max_obj=1, test_dist=None):
    # phase == 'test' dispatch of AMB.forward.
    if mask is not None:
        return memorize(params, frame, mask, num_objects)
    # NOTE: the reference forward passes (num_objects, max_obj, test_dist)
    # positionally into segment(frame, keys, values, test_dist) — an upstream
    # arg-binding bug; we call segment with the intended test_dist.
    return segment(params, frame, keys, values, test_dist)


# -----------------------------------------------------------------------------
if __name__ == "__main__":
    root = jax.random.PRNGKey(0)
    pkey, k1, k2, k3, k4 = jax.random.split(root, 5)
    params = init_amb_params(pkey)

    H = W = 64  # small input; r4 is 4x4 -> 16 memory centers
    frame0 = jax.random.normal(k1, (1, 3, H, W), jnp.float32)
    frame1 = jax.random.normal(k2, (1, 3, H, W), jnp.float32)
    fg = (jax.random.uniform(k3, (H, W)) > 0.5).astype(jnp.float32)
    mask = jnp.stack([1.0 - fg, fg])[None]                  # (1, max_obj+1, H, W)
    test_dist = jax.random.uniform(k4, (1, H, W), jnp.float32)

    # memorize (first frame)
    mem_k, mem_v, r4_m = amb_forward(params, frame0, mask=mask, num_objects=1)
    # segment (next frame)
    logit, ps = amb_forward(params, frame1, keys=mem_k, values=mem_v, test_dist=test_dist)

    jax.block_until_ready((mem_k, mem_v, r4_m, logit, ps))
    assert mem_k.shape == (1, 16, KEYDIM) and mem_v.shape == (1, 16, VALDIM)
    assert logit.shape == (1, 2, H, W) and ps.shape == (1, H, W)
    assert bool(jnp.isfinite(logit).all()) and bool(jnp.isfinite(ps).all())
    print("KERNEL_OK")
</pallas_src>

<mosaic_0001>
module attributes {stable_mosaic.version = 11 : i64} {
  func.func @_mm_kernel(%arg0: i32, %arg1: i32, %arg2: i32, %arg3: memref<256x256xbf16, #tpu.memory_space<vmem>>, %arg4: memref<256x128xbf16, #tpu.memory_space<vmem>>, %arg5: memref<1x128xf32, #tpu.memory_space<vmem>>, %arg6: memref<256x128xbf16, #tpu.memory_space<vmem>>, %arg7: memref<256x128xf32, #tpu.memory_space<vmem>>) attributes {dimension_semantics = [#tpu.dimension_semantics<parallel>, #tpu.dimension_semantics<parallel>, #tpu.dimension_semantics<arbitrary>], iteration_bounds = array<i64: 4, 1, 1>, scalar_prefetch = 0 : i64, scratch_operands = 1 : i64, tpu.core_type = #tpu.core_type<tc>, window_params = [{transform_indices = @transform_0, window_bounds = array<i64: 256, 256>}, {transform_indices = @transform_1, window_bounds = array<i64: 256, 128>}, {transform_indices = @transform_2, window_bounds = array<i64: 1, 128>}, {transform_indices = @transform_3, window_bounds = array<i64: 256, 128>}]} {
    %c0_i32 = arith.constant 0 : i32
    %0 = arith.cmpi eq, %arg2, %c0_i32 : i32
    %1 = arith.extui %0 : i1 to i32
    %c0_i32_0 = arith.constant 0 : i32
    %2 = arith.cmpi ne, %1, %c0_i32_0 : i32
    scf.if %2 {
      %cst_10 = arith.constant 0.000000e+00 : f32
      %12 = vector.broadcast %cst_10 : f32 to vector<256x128xf32>
      %c0_11 = arith.constant 0 : index
      %c0_12 = arith.constant 0 : index
      %13 = vector.load %arg7[%c0_11, %c0_12] : memref<256x128xf32, #tpu.memory_space<vmem>>, vector<256x128xf32>
      tpu.vector_store %arg7[%c0_11, %c0_12], %12 {strides = array<i32>} : memref<256x128xf32, #tpu.memory_space<vmem>>, vector<256x128xf32>,
    } else {
    }
    %c0 = arith.constant 0 : index
    %c0_1 = arith.constant 0 : index
    %3 = vector.load %arg3[%c0, %c0_1] : memref<256x256xbf16, #tpu.memory_space<vmem>>, vector<256x256xbf16>
    %c0_2 = arith.constant 0 : index
    %c0_3 = arith.constant 0 : index
    %4 = vector.load %arg7[%c0_2, %c0_3] : memref<256x128xf32, #tpu.memory_space<vmem>>, vector<256x128xf32>
    %c0_4 = arith.constant 0 : index
    %c0_5 = arith.constant 0 : index
    %5 = vector.load %arg4[%c0_4, %c0_5] : memref<256x128xbf16, #tpu.memory_space<vmem>>, vector<256x128xbf16>
    %cst = arith.constant dense<0.000000e+00> : vector<256x128xf32>
    %6 = tpu.matmul %3, %5, %cst {dimension_numbers = #tpu.dot_dimension_numbers<[1], [0], [0], [1], [0, 0, 1, 1], [], []>} : vector<256x256xbf16>, vector<256x128xbf16>, vector<256x128xf32> -> vector<256x128xf32>
    %7 = arith.addf %4, %6 : vector<256x128xf32>
    %c0_6 = arith.constant 0 : index
    %c0_7 = arith.constant 0 : index
    %8 = vector.load %arg7[%c0_6, %c0_7] : memref<256x128xf32, #tpu.memory_space<vmem>>, vector<256x128xf32>
    tpu.vector_store %arg7[%c0_6, %c0_7], %7 {strides = array<i32>} : memref<256x128xf32, #tpu.memory_space<vmem>>, vector<256x128xf32>,
    %c0_i32_8 = arith.constant 0 : i32
    %9 = arith.cmpi eq, %arg2, %c0_i32_8 : i32
    %10 = arith.extui %9 : i1 to i32
    %c0_i32_9 = arith.constant 0 : i32
    %11 = arith.cmpi ne, %10, %c0_i32_9 : i32
    scf.if %11 {
      %c0_10 = arith.constant 0 : index
      %c0_11 = arith.constant 0 : index
      %12 = vector.load %arg7[%c0_10, %c0_11] : memref<256x128xf32, #tpu.memory_space<vmem>>, vector<256x128xf32>
      %c0_12 = arith.constant 0 : index
      %c0_13 = arith.constant 0 : index
      %13 = vector.load %arg5[%c0_12, %c0_13] : memref<1x128xf32, #tpu.memory_space<vmem>>, vector<1x128xf32>
      %14 = vector.broadcast %13 : vector<1x128xf32> to vector<256x128xf32>
      %15 = arith.addf %12, %14 : vector<256x128xf32>
      %cst_14 = arith.constant 0.000000e+00 : f32
      %16 = vector.broadcast %cst_14 : f32 to vector<256x128xf32>
      %17 = arith.maximumf %15, %16 : vector<256x128xf32>
      %18 = arith.truncf %17 : vector<256x128xf32> to vector<256x128xbf16>
      %c0_15 = arith.constant 0 : index
      %c0_16 = arith.constant 0 : index
      %19 = vector.load %arg6[%c0_15, %c0_16] : memref<256x128xbf16, #tpu.memory_space<vmem>>, vector<256x128xbf16>
      tpu.vector_store %arg6[%c0_15, %c0_16], %18 {strides = array<i32>} : memref<256x128xbf16, #tpu.memory_space<vmem>>, vector<256x128xbf16>,
    } else {
    }
    return
  }
  func.func @transform_0(%arg0: i32, %arg1: i32, %arg2: i32) -> (i32, i32) {
    %c0_i32 = arith.constant 0 : i32
    return %arg0, %arg2 : i32, i32
  }
  func.func @transform_1(%arg0: i32, %arg1: i32, %arg2: i32) -> (i32, i32) {
    %c0_i32 = arith.constant 0 : i32
    return %arg2, %arg1 : i32, i32
  }
  func.func @transform_2(%arg0: i32, %arg1: i32, %arg2: i32) -> (i32, i32) {
    %c0_i32 = arith.constant 0 : i32
    %c0_i32_0 = arith.constant 0 : i32
    return %c0_i32, %arg1 : i32, i32
  }
  func.func @transform_3(%arg0: i32, %arg1: i32, %arg2: i32) -> (i32, i32) {
    %c0_i32 = arith.constant 0 : i32
    return %arg0, %arg1 : i32, i32
  }
}

</mosaic_0001>

<bundles_post_ra>
// kernel: tpu_custom_call.1
= control target key start
LH: loop header
LB: loop body
LE: loop exit
PB: predicated region body
PF: predicated region fallthrough
CT: control target
= control target key end

     0   :  { %8 = vsyncpa [#allocation4], 0  ;;  %s2253_s0 = inlined_call_operand.hbm [shape: bf16[1024,256], index: 0, kind: input, shape index: {}]   ;;  %s2254_s1 = inlined_call_operand.hbm [shape: bf16[256,128], index: 1, kind: input, shape index: {}]   ;;  %s2255_s2 = inlined_call_operand.vmem [shape: f32[1,128], index: 2, kind: input, shape index: {}]   ;;  %s2256_s3 = inlined_call_operand.hbm [shape: bf16[1024,128], index: 3, kind: output, shape index: {}]  }
   0x1   :  { %10 = vsyncpa [#allocation4 + $0x1], 0 }
   0x2   :  { %11 = vsyncpa [#allocation7], 0 }
   0x3   :  { %12 = vsyncpa [#allocation5], 0 }
   0x4   :  { %14 = vsyncpa [#allocation5 + $0x1], 0  ;;  %s1945_s12 = smov 0   ;;  %s1947_s13 = smov 0  }
   0x5   :  { %s1949_s14 = smov 0   ;;  %s1951_s15 = smov 0  }
   0x6   :  { %s1953_s16 = smov 0   ;;  %s1955_s17 = smov 0  }
   0x7 LB: > { %s1269_s18 = sadd.s32 4294967295, %s1914_s17   ;;  %s1270_s19 = sadd.s32 4294967294, %s1914_s17   ;;  %s1914_s17 = sphi %s1955_s17, %s20_s17   ;;  %s1910_s16 = sphi %s1953_s16, %s2279_s16   ;;  %s1906_s15 = sphi %s1951_s15, %s2278_s15   ;;  %s1902_s14 = sphi %s1949_s14, %s2277_s14   ;;  %s1898_s13 = sphi %s1947_s13, %s2276_s13   ;;  %s1894_s12 = sphi %s1945_s12, %s2275_s12  }
   0x8   : > { %p61_p0 = scmp.ne.s32.totalorder %s1898_s13, %s1894_s12  ;;  %p1979_p1 = scmp.eq.s32.totalorder %s1269_s18, 0 }
   0x9   : > { %p1983_p2 = scmp.eq.s32.totalorder %s1269_s18, 3  ;;  %p147_p3 = scmp.eq.s32.totalorder %s1270_s19, 3 }
   0xa   : > { %s2261_s20 = scalar_select %p1979_p1, 1, 0 }
   0xb   : > { %s2262_s21 = scalar_select %p1983_p2, 1, 0 }
   0xc   : > { %p1989_p4 = por %p1979_p1, %p61_p0  ;;  %p1271_p5 = scmp.ge.s32.totalorder %s1914_s17, 1 }
   0xd   : > { %p1994_p6 = por %p147_p3, %p61_p0  ;;  %p154_p7 = scmp.lt.s32.totalorder %s1914_s17, 5 }
   0xe   : > { %s2263_s22 = scalar_select %p1989_p4, 1, 0 }
   0xf   : > { %s2264_s23 = scalar_select %p1994_p6, 1, 0 }
  0x10   : > { %p1999_p8 = pnand %p1271_p5, %p154_p7  ;;  %s1916_s25 = smov [#allocation6]  }
  0x11   : > { %s170_s26 = sshll.u32 %s1916_s25, 4  ;;  %s39_s28 = sadd.s32 1, %s1910_s16  ;;  %s171_s26 = int_to_ptr.vmem [resolvable:$true] %s170_s26 }
  0x12   : > { %s2265_s24 = scalar_select %p1999_p8, 1, 0 }
  0x13   : > { %p1635_p9 = pneg %p1999_p8  ;;  %s1770_s4 = scalar_lea.hbm %s2254_s1, 2048 }
  0x14   : > { %p1771_p11 = scmp.ne.s32.totalorder %s2254_s1, %s1770_s4  ;;  %p1777_p3 = scmp.lt.u32.totalorder %s1770_s4, %s2254_s1 }
  0x15   : > { %p2007_p10 = pnand %p1635_p9, %p1979_p1 }
  0x17   : > { %p1772_p12 = pneg %p2007_p10 }
  0x19   : > { %p1773_p13 = pnand %p1772_p12, %p1771_p11 }
  0x1b   : > { %p1774_p0 = pneg %p1773_p13 }
  0x1d   : > { %p1779_p5 = pnand %p1777_p3, %p1774_p0 }
  0x1f   : > { %1782 = shalt.err (!%p1779_p5)
}
  0x20   : > { %s1783_s9 = scalar_lea.vmem %s171_s26, 2048  ;;  %p1791_p1 = scmp.lt.s32.totalorder %s171_s26, %s171_s26 }
  0x21   : > { %p1784_p7 = scmp.ne.s32.totalorder %s171_s26, %s1783_s9  ;;  %p1792_p4 = scmp.lt.s32.totalorder %s1783_s9, %s1783_s9 }
  0x23   : > { %p1786_p9 = pnand %p1784_p7, %p1772_p12  ;;  %p1793_p8 = por %p1792_p4, %p1791_p1 }
  0x25   : > { %p1787_p6 = pneg %p1786_p9 }
  0x27   : > { %p1794_p2 = pnand %p1793_p8, %p1787_p6 }
  0x29   : > { %1797 = shalt.err (!%p1794_p2)
}
  0x2a   : > { %s1917_s10 = smov 64   ;;  %s1918_s11 = smov 4  }
  0x2b   : > { %1638 = dma.hbm_to_vmem [thread:$0]  (!%p2007_p10), %s2254_s1, 2048, %s171_s26, [#allocation7], %s1917_s10, %s1917_s10, %s1918_s11  }
  0x2c   : > { %p41_p1 = scmp.ge.s32.totalorder %s39_s28, 4  ;;  %s48_s25 = sadd.s32 1, %s1902_s14 }
  0x2d   : > { %p55_p2 = scmp.ne.s32.totalorder %s1902_s14, %s1898_s13  ;;  %p56_p4 = scmp.eq.s32.totalorder %s1914_s17, 0 }
  0x2e   : > { %s2281_s28 = smov (%p41_p1, %s39_s28), 0  ;;  %p2268_p8 = scmp.ne.s32.totalorder %s2262_s21, 0 }
  0x2f   : > { %p2034_p6 = por %p56_p4, %p55_p2  ;;  %s43_s27 = ssub.s32 %s1910_s16, %s2281_s28 }
  0x30   : > { %p2040_p11 = por %p2268_p8, %p55_p2  ;;  %p1648_p12 = scmp.lt.s32.totalorder %s1914_s17, 4 }
  0x31   : > { %p46_p10 = scmp.eq.s32.totalorder %s43_s27, 0  ;;  %s190_s26 = sand.u32 1, %s1902_s14  }
  0x32   : > { %s1275_s4 = sshll.u32 %s190_s26, 8  ;;  %s1370_s6 = sshll.u32 %s1910_s16, 12 }
  0x33   : > { %s2049_s5 = scalar_select %p46_p10, %s1902_s14, %s48_s25  }
  0x34   : > { %s2055_s9 = scalar_lea.hbm %s2253_s0, %s1370_s6  ;;  %s194_s21 = scalar_lea.vmem [#allocation3], %s1275_s4 }
  0x35   : > { %s204_s10 = sshll.u32 %s194_s21, 4  ;;  %p2061_p13 = pnand %p1648_p12, %p2034_p6  ;;  %s2057_s10 = int_to_ptr.vmem [resolvable:$true] %s204_s10 }
  0x36   : > { %s2065_s18 = scalar_lea.sflag [#allocation4], %s190_s26  ;;  %s1798_s19 = scalar_lea.hbm %s2055_s9, 4096 }
  0x37   : > { %p1799_p0 = scmp.ne.s32.totalorder %s2055_s9, %s1798_s19  ;;  %p1800_p3 = pneg %p2061_p13 }
  0x38   : > { %s1803_s29 = scalar_lea.hbm %s2253_s0, 16384  ;;  %p1804_p9 = scmp.lt.u32.totalorder %s2055_s9, %s2253_s0 }
  0x39   : > { %p1801_p5 = pnand %p1800_p3, %p1799_p0  ;;  %p1805_p1 = scmp.lt.u32.totalorder %s1803_s29, %s1798_s19 }
  0x3a   : > { %p1807_p4 = scmp.lt.u32.totalorder %s1798_s19, %s2055_s9 }
  0x3b   : > { %p1802_p7 = pneg %p1801_p5  ;;  %p1806_p2 = por %p1805_p1, %p1804_p9 }
  0x3d   : > { %p1808_p6 = por %p1807_p4, %p1806_p2 }
  0x3f   : > { %p1809_p8 = pnand %p1808_p6, %p1802_p7 }
  0x41   : > { %1812 = shalt.err (!%p1809_p8)
}
  0x42   : > { %s1813_s26 = scalar_lea.vmem %s2057_s10, 4096  ;;  %s1919_s7 = smov [#allocation3]  }
  0x43   : > { %p1814_p12 = scmp.ne.s32.totalorder %s2057_s10, %s1813_s26  ;;  %s1818_s8 = sshll.u32 %s1919_s7, 4  ;;  %s1819_s8 = int_to_ptr.vmem [resolvable:$false] %s1818_s8 }
  0x44   : > { %s1820_s21 = scalar_lea.vmem %s1819_s8, 8192  ;;  %p1821_p5 = scmp.lt.s32.totalorder %s2057_s10, %s1819_s8 }
  0x45   : > { %p1816_p10 = pnand %p1814_p12, %p1800_p3  ;;  %p1822_p9 = scmp.lt.s32.totalorder %s1820_s21, %s1813_s26 }
  0x47   : > { %p1817_p0 = pneg %p1816_p10  ;;  %p1823_p1 = por %p1822_p9, %p1821_p5 }
  0x49   : > { %p1824_p2 = pnand %p1823_p1, %p1817_p0 }
  0x4b   : > { %1827 = shalt.err (!%p1824_p2)
}
  0x4c   : > { %s1920_s19 = smov 128   ;;  %s1921_s25 = smov 8  }
  0x4d   : > { %1642 = dma.hbm_to_vmem [thread:$0]  (!%p2061_p13), %s2055_s9, 4096, %s2057_s10, %s2065_s18, %s1920_s19, %s1920_s19, %s1921_s25  }
  0x4e   : > { %p2271_p3 = scmp.ne.s32.totalorder %s2265_s24, 0 }
  0x4f   : > { %s2096_s27 = sand.u32 (!%p2271_p3), 1, %s1898_s13   ;;  %p2272_p7 = scmp.ne.s32.totalorder (!%p2271_p3), %s2263_s22, 0 }
  0x50   : > { %216 = sbr.rel (%p2271_p3) target bundleno = 419 (0x1a3), region = 32  ;;  %s1280_s29 = sshll.u32 (!%p2271_p3), %s2096_s27, 8 }
  0x51   : > { %s219_s4 = scalar_lea.sflag (!%p2271_p3), [#allocation4], %s2096_s27  ;;  %s2100_s6 = scalar_lea.vmem (!%p2271_p3), [#allocation3], %s1280_s29 }
  0x57   : > { %1881 = dma.done.wait (%p2272_p7), %s219_s4, 4096  }
  0x58   : > { %1883 = vsyncadd (%p2272_p7), %s219_s4, 4294963200  ;;  %p2273_p13 = scmp.ne.s32.totalorder %s2261_s20, 0 }
  0x5a   : > { %1885 = dma.done.wait (%p2273_p13), [#allocation7], 2048  }
  0x5b   : > { %1887 = vsyncadd (%p2273_p13), [#allocation7], 4294965248  ;;  %v1706_v0 = vld [vmem:[#allocation6 + $0x40] sm:$0xff]   ;;  %v1708_v2 = vld [vmem:[#allocation6 + $0x48] sm:$0xff]   ;;  %s1282_s24 = sshll.u32 %s2096_s27, 7  ;;  %s1403_s10 = sshll.u32 %s1906_s15, 11 }
  0x5c   : > { %v1707_v1 = vld [vmem:[#allocation6] sm:$0xff]   ;;  %1499 = vmatprep.subr.bf16.mxu0 %v1706_v0  ;;  %1611 = vmatprep.subr.bf16.mxu1 %v1706_v0  ;;  %v1709_v3 = vld [vmem:[#allocation6 + $0x8] sm:$0xff]   ;;  %v1710_v4 = vld [vmem:[#allocation6 + $0x50] sm:$0xff]   ;;  %s2152_s9 = scalar_lea.vmem [#allocation8], %s1282_s24  ;;  %s2201_s7 = scalar_lea.hbm %s2256_s3, %s1403_s10 }
  0x5d   : > { %1500 = vmatpush3.bf16.msra.mxu0 %v1707_v1  ;;  %1619 = vmatpush3.bf16.msra.mxu1 %v1707_v1  ;;  %v1711_v5 = vld [vmem:[#allocation6 + $0x10] sm:$0xff]   ;;  %v1712_v6 = vld [vmem:[#allocation6 + $0x58] sm:$0xff]   ;;  %v1714_v8 = vld [vmem:[#allocation6 + $0x60] sm:$0xff]   ;;  %s1154_s11 = sshll.u32 %s2152_s9, 4  ;;  %s1140_s15 = scalar_lea.sflag [#allocation5], %s2096_s27  ;;  %s2203_s11 = int_to_ptr.vmem [resolvable:$true] %s1154_s11 }
  0x5e   : > { %1501 = vmatprep.subr.bf16.mxu0 %v1708_v2  ;;  %1612 = vmatprep.subr.bf16.mxu1 %v1708_v2  ;;  %v1713_v7 = vld [vmem:[#allocation6 + $0x18] sm:$0xff]   ;;  %v1715_v9 = vld [vmem:[#allocation6 + $0x20] sm:$0xff]   ;;  %v1716_v10 = vld [vmem:[#allocation6 + $0x68] sm:$0xff]   ;;  %s1828_s8 = scalar_lea.vmem %s2203_s11, 2048  ;;  %s1922_s21 = smov [#allocation8]  }
  0x5f   : > { %v1724_v11 = vld [vmem:[%s2100_s6 + $0x4] ss:$8 sps:$4 sm:$0xff]   ;;  %v1718_v14 = vld [vmem:[#allocation6 + $0x70] sm:$0xff]   ;;  %v1720_v16 = vld [vmem:[#allocation6 + $0x78] sm:$0xff]   ;;  %p1829_p4 = scmp.ne.s32.totalorder %s2203_s11, %s1828_s8  ;;  %s1832_s19 = sshll.u32 %s1922_s21, 4  ;;  %s1833_s19 = int_to_ptr.vmem [resolvable:$false] %s1832_s19 }
  0x60   : > { %v1727_v12 = vld [vmem:[%s2100_s6 + $0x84] ss:$8 sps:$4 sm:$0xff]   ;;  %680 = vmatprep.mubr.bf16.mxu0 %v1724_v11  ;;  %v1719_v15 = vld [vmem:[#allocation6 + $0x30] sm:$0xff]   ;;  %v1721_v17 = vld [vmem:[#allocation6 + $0x38] sm:$0xff]   ;;  %s1834_s25 = scalar_lea.vmem %s1833_s19, 4096  ;;  %p1835_p12 = scmp.lt.s32.totalorder %s2203_s11, %s1833_s19 }
  0x61   : > { %1502 = vmatpush3.bf16.msra.mxu0 %v1709_v3  ;;  %1620 = vmatpush3.bf16.msra.mxu1 %v1709_v3  ;;  %v1717_v13 = vld [vmem:[#allocation6 + $0x28] sm:$0xff]   ;;  %v1728_v20 = vld [vmem:[%s2100_s6 + $0x14] ss:$8 sps:$4 sm:$0xff]   ;;  %v1732_v22 = vld [vmem:[%s2100_s6 + $0x10] ss:$8 sps:$4 sm:$0xff]   ;;  %p1830_p6 = pnand %p1829_p4, %p2040_p11  ;;  %p1836_p10 = scmp.lt.s32.totalorder %s1834_s25, %s1828_s8 }
  0x62   : > { %1503 = vmatprep.subr.bf16.mxu0 %v1710_v4  ;;  %1613 = vmatprep.subr.bf16.mxu1 %v1710_v4  ;;  %v1722_v18 = vld [vmem:[%s2100_s6] ss:$8 sps:$4 sm:$0xff]   ;;  %v1730_v21 = vld [vmem:[%s2100_s6 + $0x94] ss:$8 sps:$4 sm:$0xff]   ;;  %v1733_v23 = vld [vmem:[%s2100_s6 + $0x90] ss:$8 sps:$4 sm:$0xff]  }
  0x63   : > { %744 = vmatprep.mubr.bf16.mxu1 %v1727_v12  ;;  %v1725_v19 = vld [vmem:[%s2100_s6 + $0x80] ss:$8 sps:$4 sm:$0xff]   ;;  %v1734_v24 = vld [vmem:[%s2100_s6 + $0x24] ss:$8 sps:$4 sm:$0xff]   ;;  %v1740_v28 = vld [vmem:[%s2100_s6 + $0x34] ss:$8 sps:$4 sm:$0xff]   ;;  %p1831_p8 = pneg %p1830_p6  ;;  %p1837_p0 = por %p1836_p10, %p1835_p12 }
  0x64   : > { %v1736_v25 = vld [vmem:[%s2100_s6 + $0xa4] ss:$8 sps:$4 sm:$0xff]   ;;  %v1738_v26 = vld [vmem:[%s2100_s6 + $0x20] ss:$8 sps:$4 sm:$0xff]   ;;  %v1742_v29 = vld [vmem:[%s2100_s6 + $0xb4] ss:$8 sps:$4 sm:$0xff]  }
  0x65   : > { %1504 = vmatpush3.bf16.msra.mxu0 %v1711_v5  ;;  %1621 = vmatpush3.bf16.msra.mxu1 %v1711_v5  ;;  %v1739_v27 = vld [vmem:[%s2100_s6 + $0xa0] ss:$8 sps:$4 sm:$0xff]   ;;  %v1744_v30 = vld [vmem:[%s2100_s6 + $0x30] ss:$8 sps:$4 sm:$0xff]   ;;  %v1746_v32 = vld [vmem:[%s2100_s6 + $0x44] ss:$8 sps:$4 sm:$0xff]   ;;  %p1838_p5 = pnand %p1837_p0, %p1831_p8 }
  0x66   : > { %1505 = vmatprep.subr.bf16.mxu0 %v1712_v6  ;;  %1614 = vmatprep.subr.bf16.mxu1 %v1712_v6  ;;  %v1745_v31 = vld [vmem:[%s2100_s6 + $0xb0] ss:$8 sps:$4 sm:$0xff]   ;;  %v1748_v33 = vld [vmem:[%s2100_s6 + $0xc4] ss:$8 sps:$4 sm:$0xff]   ;;  %v1750_v34 = vld [vmem:[%s2100_s6 + $0x40] ss:$8 sps:$4 sm:$0xff]  }
  0x67   : > { %v1751_v35 = vld [vmem:[%s2100_s6 + $0xc0] ss:$8 sps:$4 sm:$0xff]   ;;  %v1752_v36 = vld [vmem:[%s2100_s6 + $0x54] ss:$8 sps:$4 sm:$0xff]   ;;  %v1756_v38 = vld [vmem:[%s2100_s6 + $0x50] ss:$8 sps:$4 sm:$0xff]  }
  0x68   : > { %v1754_v37 = vld [vmem:[%s2100_s6 + $0xd4] ss:$8 sps:$4 sm:$0xff]   ;;  %v1757_v39 = vld [vmem:[%s2100_s6 + $0xd0] ss:$8 sps:$4 sm:$0xff]   ;;  %v1758_v40 = vld [vmem:[%s2100_s6 + $0x64] ss:$8 sps:$4 sm:$0xff]  }
  0x69   : > { %1506 = vmatpush3.bf16.msra.mxu0 %v1713_v7  ;;  %1622 = vmatpush3.bf16.msra.mxu1 %v1713_v7  ;;  %v1760_v41 = vld [vmem:[%s2100_s6 + $0xe4] ss:$8 sps:$4 sm:$0xff]   ;;  %v1762_v42 = vld [vmem:[%s2100_s6 + $0x60] ss:$8 sps:$4 sm:$0xff]   ;;  %v1764_v44 = vld [vmem:[%s2100_s6 + $0x74] ss:$8 sps:$4 sm:$0xff]  }
  0x6a   : > { %1507 = vmatprep.subr.bf16.mxu0 %v1714_v8  ;;  %1615 = vmatprep.subr.bf16.mxu1 %v1714_v8  ;;  %v1763_v43 = vld [vmem:[%s2100_s6 + $0xe0] ss:$8 sps:$4 sm:$0xff]   ;;  %v1766_v45 = vld [vmem:[%s2100_s6 + $0xf4] ss:$8 sps:$4 sm:$0xff]   ;;  %v1768_v46 = vld [vmem:[%s2100_s6 + $0x70] ss:$8 sps:$4 sm:$0xff]  }
  0x6b   : > { %v1769_v47 = vld [vmem:[%s2100_s6 + $0xf0] ss:$8 sps:$4 sm:$0xff]   ;;  %v2145_v51 = vld [vmem:[%s2255_s2] ss:$0 sm:$0xff] }
  0x6d   : > { %1508 = vmatpush3.bf16.msra.mxu0 %v1715_v9  ;;  %1623 = vmatpush3.bf16.msra.mxu1 %v1715_v9 }
  0x6e   : > { %1509 = vmatprep.subr.bf16.mxu0 %v1716_v10  ;;  %1616 = vmatprep.subr.bf16.mxu1 %v1716_v10 }
  0x71   : > { %1510 = vmatpush3.bf16.msra.mxu0 %v1717_v13  ;;  %1624 = vmatpush3.bf16.msra.mxu1 %v1717_v13 }
  0x72   : > { %1511 = vmatprep.subr.bf16.mxu0 %v1718_v14  ;;  %1617 = vmatprep.subr.bf16.mxu1 %v1718_v14 }
  0x75   : > { %1512 = vmatpush3.bf16.msra.mxu0 %v1719_v15  ;;  %1625 = vmatpush3.bf16.msra.mxu1 %v1719_v15 }
  0x76   : > { %1513 = vmatprep.subr.bf16.mxu0 %v1720_v16  ;;  %1618 = vmatprep.subr.bf16.mxu1 %v1720_v16 }
  0x79   : > { %1514 = vmatpush3.bf16.msra.mxu0 %v1721_v17  ;;  %1626 = vmatpush3.bf16.msra.mxu1 %v1721_v17 }
  0x7c   : > { %681 = vmatmul.mubr.bf16.vlgmr.msra.gmra.mrb[0].mxu0 %v1722_v18  ;;  %745 = vmatmul.mubr.bf16.vlgmr.msra.gmra.mrb[0].mxu1 %v1725_v19 }
  0x7d   : > { %688 = vmatprep.mubr.bf16.mxu0 %v1728_v20  ;;  %752 = vmatprep.mubr.bf16.mxu1 %v1730_v21 }
  0x84   : > { %689 = vmatmul.mubr.bf16.gmra.mrb[4].mxu0 %v1732_v22  ;;  %753 = vmatmul.mubr.bf16.gmra.mrb[4].mxu1 %v1733_v23 }
  0x85   : > { %696 = vmatprep.mubr.bf16.mxu0 %v1734_v24  ;;  %760 = vmatprep.mubr.bf16.mxu1 %v1736_v25 }
  0x8c   : > { %697 = vmatmul.mubr.bf16.gmra.mrb[8].mxu0 %v1738_v26  ;;  %761 = vmatmul.mubr.bf16.gmra.mrb[8].mxu1 %v1739_v27 }
  0x8d   : > { %704 = vmatprep.mubr.bf16.mxu0 %v1740_v28  ;;  %768 = vmatprep.mubr.bf16.mxu1 %v1742_v29 }
  0x94   : > { %705 = vmatmul.mubr.bf16.gmra.mrb[12].mxu0 %v1744_v30  ;;  %769 = vmatmul.mubr.bf16.gmra.mrb[12].mxu1 %v1745_v31 }
  0x95   : > { %712 = vmatprep.mubr.bf16.mxu0 %v1746_v32  ;;  %776 = vmatprep.mubr.bf16.mxu1 %v1748_v33 }
  0x9c   : > { %713 = vmatmul.mubr.bf16.gmra.mrb[16].mxu0 %v1750_v34  ;;  %777 = vmatmul.mubr.bf16.gmra.mrb[16].mxu1 %v1751_v35 }
  0x9d   : > { %720 = vmatprep.mubr.bf16.mxu0 %v1752_v36  ;;  %784 = vmatprep.mubr.bf16.mxu1 %v1754_v37 }
  0xa4   : > { %721 = vmatmul.mubr.bf16.gmra.mrb[20].mxu0 %v1756_v38  ;;  %785 = vmatmul.mubr.bf16.gmra.mrb[20].mxu1 %v1757_v39 }
  0xa5   : > { %728 = vmatprep.mubr.bf16.mxu0 %v1758_v40  ;;  %792 = vmatprep.mubr.bf16.mxu1 %v1760_v41 }
  0xac   : > { %729 = vmatmul.mubr.bf16.gmra.mrb[24].mxu0 %v1762_v42  ;;  %793 = vmatmul.mubr.bf16.gmra.mrb[24].mxu1 %v1763_v43 }
  0xad   : > { %736 = vmatprep.mubr.bf16.mxu0 %v1764_v44  ;;  %800 = vmatprep.mubr.bf16.mxu1 %v1766_v45 }
  0xb4   : > { %737 = vmatmul.mubr.bf16.gmra.mrb[28].mxu0 %v1768_v46  ;;  %801 = vmatmul.mubr.bf16.gmra.mrb[28].mxu1 %v1769_v47 }
 0x14f   : > { %v1515_v48 = vpop.f32.mrb[0].mxu0  ;;  %v1563_v49 = vpop.f32.mrb[0].mxu1 }
 0x150   : > { %v1516_v50 = vpop.f32.mrb[1].mxu0  ;;  %v1564_v52 = vpop.f32.mrb[1].mxu1 }
 0x151   : > { %v1517_v53 = vadd.f32 %v1516_v50, %v1515_v48  ;;  %v1565_v54 = vadd.f32 %v1564_v52, %v1563_v49  ;;  %v1518_v55 = vpop.f32.mrb[2].mxu0  ;;  %v1566_v56 = vpop.f32.mrb[2].mxu1 }
 0x152   : > { %v1519_v57 = vpop.f32.mrb[3].mxu0  ;;  %v1567_v58 = vpop.f32.mrb[3].mxu1 }
 0x153   : > { %v915_v59 = vadd.f32 %v1517_v53, %v2145_v51  ;;  %v931_v60 = vadd.f32 %v1565_v54, %v2145_v51  ;;  %v1520_v61 = vadd.f32 %v1519_v57, %v1518_v55  ;;  %v1568_v62 = vadd.f32 %v1567_v58, %v1566_v56 }
 0x155   : > { %v916_v63 = vadd.f32 %v1520_v61, %v2145_v51  ;;  %v932_v0 = vadd.f32 %v1568_v62, %v2145_v51  ;;  %v947_v1 = vmax.f32 %v915_v59, 0.0  ;;  %v963_v2 = vmax.f32 %v931_v60, 0.0 }
 0x157   : > { %v948_v3 = vmax.f32 %v916_v63, 0.0  ;;  %v964_v4 = vmax.f32 %v932_v0, 0.0  ;;  %v1521_v5 = vpop.f32.mrb[4].mxu0  ;;  %v1569_v6 = vpop.f32.mrb[4].mxu1 }
 0x158   : > { %v1522_v7 = vpop.f32.mrb[5].mxu0  ;;  %v1570_v8 = vpop.f32.mrb[5].mxu1 }
 0x159   : > { %v1407_v9 = vpack.c.bf16 %v948_v3, %v947_v1  ;;  %v1447_v10 = vpack.c.bf16 %v964_v4, %v963_v2  ;;  %v1523_v11 = vadd.f32 %v1522_v7, %v1521_v5  ;;  %v1571_v12 = vadd.f32 %v1570_v8, %v1569_v6  ;;  %v1524_v13 = vpop.f32.mrb[6].mxu0  ;;  %v1572_v14 = vpop.f32.mrb[6].mxu1 }
 0x15a   : > { %v1525_v15 = vpop.f32.mrb[7].mxu0  ;;  %v1573_v16 = vpop.f32.mrb[7].mxu1 }
 0x15b   : > { %1408 = vst [vmem:[%s2152_s9] sm:$0xff] %v1407_v9   ;;  %1491 = vst [vmem:[%s2152_s9 + $0x40] sm:$0xff] %v1447_v10   ;;  %v917_v17 = vadd.f32 %v1523_v11, %v2145_v51  ;;  %v933_v18 = vadd.f32 %v1571_v12, %v2145_v51  ;;  %v1526_v19 = vadd.f32 %v1525_v15, %v1524_v13 }
 0x15c   : > { %v1574_v20 = vadd.f32 %v1573_v16, %v1572_v14 }
 0x15d   : > { %v918_v21 = vadd.f32 %v1526_v19, %v2145_v51  ;;  %v949_v23 = vmax.f32 %v917_v17, 0.0  ;;  %v965_v24 = vmax.f32 %v933_v18, 0.0 }
 0x15e   : > { %v934_v22 = vadd.f32 %v1574_v20, %v2145_v51 }
 0x15f   : > { %v950_v25 = vmax.f32 %v918_v21, 0.0  ;;  %v1527_v27 = vpop.f32.mrb[8].mxu0  ;;  %v1575_v28 = vpop.f32.mrb[8].mxu1 }
 0x160   : > { %v966_v26 = vmax.f32 %v934_v22, 0.0  ;;  %v1528_v29 = vpop.f32.mrb[9].mxu0  ;;  %v1576_v30 = vpop.f32.mrb[9].mxu1 }
 0x161   : > { %v1412_v31 = vpack.c.bf16 %v950_v25, %v949_v23  ;;  %v1529_v33 = vadd.f32 %v1528_v29, %v1527_v27  ;;  %v1577_v34 = vadd.f32 %v1576_v30, %v1575_v28  ;;  %v1530_v35 = vpop.f32.mrb[10].mxu0  ;;  %v1578_v36 = vpop.f32.mrb[10].mxu1 }
 0x162   : > { %v1452_v32 = vpack.c.bf16 %v966_v26, %v965_v24  ;;  %v1531_v37 = vpop.f32.mrb[11].mxu0  ;;  %v1579_v38 = vpop.f32.mrb[11].mxu1 }
 0x163   : > { %1484 = vst [vmem:[%s2152_s9 + $0x8] sm:$0xff] %v1412_v31   ;;  %v919_v39 = vadd.f32 %v1529_v33, %v2145_v51  ;;  %v935_v40 = vadd.f32 %v1577_v34, %v2145_v51  ;;  %v1532_v41 = vadd.f32 %v1531_v37, %v1530_v35  ;;  %v1580_v42 = vadd.f32 %v1579_v38, %v1578_v36 }
 0x164   : > { %1492 = vst [vmem:[%s2152_s9 + $0x48] sm:$0xff] %v1452_v32  }
 0x165   : > { %v920_v43 = vadd.f32 %v1532_v41, %v2145_v51  ;;  %v936_v44 = vadd.f32 %v1580_v42, %v2145_v51  ;;  %v951_v45 = vmax.f32 %v919_v39, 0.0  ;;  %v967_v46 = vmax.f32 %v935_v40, 0.0 }
 0x167   : > { %v952_v47 = vmax.f32 %v920_v43, 0.0  ;;  %v968_v48 = vmax.f32 %v936_v44, 0.0  ;;  %v1533_v49 = vpop.f32.mrb[12].mxu0  ;;  %v1581_v50 = vpop.f32.mrb[12].mxu1 }
 0x168   : > { %v1534_v52 = vpop.f32.mrb[13].mxu0  ;;  %v1582_v53 = vpop.f32.mrb[13].mxu1 }
 0x169   : > { %v1417_v54 = vpack.c.bf16 %v952_v47, %v951_v45  ;;  %v1457_v55 = vpack.c.bf16 %v968_v48, %v967_v46  ;;  %v1535_v56 = vadd.f32 %v1534_v52, %v1533_v49  ;;  %v1583_v57 = vadd.f32 %v1582_v53, %v1581_v50  ;;  %v1536_v58 = vpop.f32.mrb[14].mxu0  ;;  %v1584_v59 = vpop.f32.mrb[14].mxu1 }
 0x16a   : > { %v1537_v60 = vpop.f32.mrb[15].mxu0  ;;  %v1585_v61 = vpop.f32.mrb[15].mxu1 }
 0x16b   : > { %1485 = vst [vmem:[%s2152_s9 + $0x10] sm:$0xff] %v1417_v54   ;;  %1493 = vst [vmem:[%s2152_s9 + $0x50] sm:$0xff] %v1457_v55   ;;  %v921_v62 = vadd.f32 %v1535_v56, %v2145_v51  ;;  %v937_v63 = vadd.f32 %v1583_v57, %v2145_v51  ;;  %v1538_v0 = vadd.f32 %v1537_v60, %v1536_v58 }
 0x16c   : > { %v1586_v1 = vadd.f32 %v1585_v61, %v1584_v59 }
 0x16d   : > { %v922_v2 = vadd.f32 %v1538_v0, %v2145_v51  ;;  %v953_v4 = vmax.f32 %v921_v62, 0.0  ;;  %v969_v5 = vmax.f32 %v937_v63, 0.0 }
 0x16e   : > { %v938_v3 = vadd.f32 %v1586_v1, %v2145_v51 }
 0x16f   : > { %v954_v6 = vmax.f32 %v922_v2, 0.0  ;;  %v1539_v8 = vpop.f32.mrb[16].mxu0  ;;  %v1587_v9 = vpop.f32.mrb[16].mxu1 }
 0x170   : > { %v970_v7 = vmax.f32 %v938_v3, 0.0  ;;  %v1540_v10 = vpop.f32.mrb[17].mxu0  ;;  %v1588_v11 = vpop.f32.mrb[17].mxu1 }
 0x171   : > { %v1422_v12 = vpack.c.bf16 %v954_v6, %v953_v4  ;;  %v1541_v14 = vadd.f32 %v1540_v10, %v1539_v8  ;;  %v1589_v15 = vadd.f32 %v1588_v11, %v1587_v9  ;;  %v1542_v16 = vpop.f32.mrb[18].mxu0  ;;  %v1590_v17 = vpop.f32.mrb[18].mxu1 }
 0x172   : > { %v1462_v13 = vpack.c.bf16 %v970_v7, %v969_v5  ;;  %v1543_v18 = vpop.f32.mrb[19].mxu0  ;;  %v1591_v19 = vpop.f32.mrb[19].mxu1 }
 0x173   : > { %1486 = vst [vmem:[%s2152_s9 + $0x18] sm:$0xff] %v1422_v12   ;;  %v923_v20 = vadd.f32 %v1541_v14, %v2145_v51  ;;  %v939_v21 = vadd.f32 %v1589_v15, %v2145_v51  ;;  %v1544_v22 = vadd.f32 %v1543_v18, %v1542_v16  ;;  %v1592_v23 = vadd.f32 %v1591_v19, %v1590_v17 }
 0x174   : > { %1494 = vst [vmem:[%s2152_s9 + $0x58] sm:$0xff] %v1462_v13  }
 0x175   : > { %v924_v24 = vadd.f32 %v1544_v22, %v2145_v51  ;;  %v940_v25 = vadd.f32 %v1592_v23, %v2145_v51  ;;  %v955_v26 = vmax.f32 %v923_v20, 0.0  ;;  %v971_v27 = vmax.f32 %v939_v21, 0.0 }
 0x177   : > { %v956_v28 = vmax.f32 %v924_v24, 0.0  ;;  %v972_v29 = vmax.f32 %v940_v25, 0.0  ;;  %v1545_v30 = vpop.f32.mrb[20].mxu0  ;;  %v1593_v31 = vpop.f32.mrb[20].mxu1 }
 0x178   : > { %v1546_v32 = vpop.f32.mrb[21].mxu0  ;;  %v1594_v33 = vpop.f32.mrb[21].mxu1 }
 0x179   : > { %v1427_v34 = vpack.c.bf16 %v956_v28, %v955_v26  ;;  %v1467_v35 = vpack.c.bf16 %v972_v29, %v971_v27  ;;  %v1547_v36 = vadd.f32 %v1546_v32, %v1545_v30  ;;  %v1595_v37 = vadd.f32 %v1594_v33, %v1593_v31  ;;  %v1548_v38 = vpop.f32.mrb[22].mxu0  ;;  %v1596_v39 = vpop.f32.mrb[22].mxu1 }
 0x17a   : > { %v1549_v40 = vpop.f32.mrb[23].mxu0  ;;  %v1597_v41 = vpop.f32.mrb[23].mxu1 }
 0x17b   : > { %1487 = vst [vmem:[%s2152_s9 + $0x20] sm:$0xff] %v1427_v34   ;;  %1495 = vst [vmem:[%s2152_s9 + $0x60] sm:$0xff] %v1467_v35   ;;  %v925_v42 = vadd.f32 %v1547_v36, %v2145_v51  ;;  %v941_v43 = vadd.f32 %v1595_v37, %v2145_v51  ;;  %v1550_v44 = vadd.f32 %v1549_v40, %v1548_v38 }
 0x17c   : > { %v1598_v45 = vadd.f32 %v1597_v41, %v1596_v39 }
 0x17d   : > { %v926_v46 = vadd.f32 %v1550_v44, %v2145_v51  ;;  %v957_v48 = vmax.f32 %v925_v42, 0.0  ;;  %v973_v49 = vmax.f32 %v941_v43, 0.0 }
 0x17e   : > { %v942_v47 = vadd.f32 %v1598_v45, %v2145_v51 }
 0x17f   : > { %v958_v50 = vmax.f32 %v926_v46, 0.0  ;;  %v1551_v53 = vpop.f32.mrb[24].mxu0  ;;  %v1599_v54 = vpop.f32.mrb[24].mxu1 }
 0x180   : > { %v974_v52 = vmax.f32 %v942_v47, 0.0  ;;  %v1552_v55 = vpop.f32.mrb[25].mxu0  ;;  %v1600_v56 = vpop.f32.mrb[25].mxu1 }
 0x181   : > { %v1432_v57 = vpack.c.bf16 %v958_v50, %v957_v48  ;;  %v1553_v59 = vadd.f32 %v1552_v55, %v1551_v53  ;;  %v1601_v60 = vadd.f32 %v1600_v56, %v1599_v54  ;;  %v1554_v61 = vpop.f32.mrb[26].mxu0  ;;  %v1602_v62 = vpop.f32.mrb[26].mxu1 }
 0x182   : > { %v1472_v58 = vpack.c.bf16 %v974_v52, %v973_v49  ;;  %v1555_v63 = vpop.f32.mrb[27].mxu0  ;;  %v1603_v0 = vpop.f32.mrb[27].mxu1 }
 0x183   : > { %1488 = vst [vmem:[%s2152_s9 + $0x28] sm:$0xff] %v1432_v57   ;;  %v927_v1 = vadd.f32 %v1553_v59, %v2145_v51  ;;  %v943_v2 = vadd.f32 %v1601_v60, %v2145_v51  ;;  %v1556_v3 = vadd.f32 %v1555_v63, %v1554_v61  ;;  %v1604_v4 = vadd.f32 %v1603_v0, %v1602_v62 }
 0x184   : > { %1496 = vst [vmem:[%s2152_s9 + $0x68] sm:$0xff] %v1472_v58  }
 0x185   : > { %v928_v5 = vadd.f32 %v1556_v3, %v2145_v51  ;;  %v944_v6 = vadd.f32 %v1604_v4, %v2145_v51  ;;  %v959_v7 = vmax.f32 %v927_v1, 0.0  ;;  %v975_v8 = vmax.f32 %v943_v2, 0.0 }
 0x187   : > { %v960_v9 = vmax.f32 %v928_v5, 0.0  ;;  %v976_v10 = vmax.f32 %v944_v6, 0.0  ;;  %v1557_v11 = vpop.f32.mrb[28].mxu0  ;;  %v1605_v12 = vpop.f32.mrb[28].mxu1 }
 0x188   : > { %v1558_v13 = vpop.f32.mrb[29].mxu0  ;;  %v1606_v14 = vpop.f32.mrb[29].mxu1 }
 0x189   : > { %v1437_v15 = vpack.c.bf16 %v960_v9, %v959_v7  ;;  %v1477_v16 = vpack.c.bf16 %v976_v10, %v975_v8  ;;  %v1559_v17 = vadd.f32 %v1558_v13, %v1557_v11  ;;  %v1607_v18 = vadd.f32 %v1606_v14, %v1605_v12  ;;  %v1560_v19 = vpop.f32.mrb[30].mxu0  ;;  %v1608_v20 = vpop.f32.mrb[30].mxu1 }
 0x18a   : > { %v1561_v21 = vpop.f32.mrb[31].mxu0  ;;  %v1609_v22 = vpop.f32.mrb[31].mxu1 }
 0x18b   : > { %1489 = vst [vmem:[%s2152_s9 + $0x30] sm:$0xff] %v1437_v15   ;;  %1497 = vst [vmem:[%s2152_s9 + $0x70] sm:$0xff] %v1477_v16   ;;  %v929_v23 = vadd.f32 %v1559_v17, %v2145_v51  ;;  %v945_v24 = vadd.f32 %v1607_v18, %v2145_v51  ;;  %v1562_v25 = vadd.f32 %v1561_v21, %v1560_v19 }
 0x18c   : > { %v1610_v26 = vadd.f32 %v1609_v22, %v1608_v20 }
 0x18d   : > { %v930_v27 = vadd.f32 %v1562_v25, %v2145_v51  ;;  %v961_v29 = vmax.f32 %v929_v23, 0.0  ;;  %v977_v30 = vmax.f32 %v945_v24, 0.0 }
 0x18e   : > { %v946_v28 = vadd.f32 %v1610_v26, %v2145_v51 }
 0x18f   : > { %v962_v31 = vmax.f32 %v930_v27, 0.0 }
 0x190   : > { %v978_v32 = vmax.f32 %v946_v28, 0.0 }
 0x191   : > { %v1442_v33 = vpack.c.bf16 %v962_v31, %v961_v29 }
 0x192   : > { %v1482_v34 = vpack.c.bf16 %v978_v32, %v977_v30 }
 0x193   : > { %1490 = vst [vmem:[%s2152_s9 + $0x38] sm:$0xff] %v1442_v33  }
 0x194   : > { %1498 = vst [vmem:[%s2152_s9 + $0x78] sm:$0xff] %v1482_v34  }
 0x195   : > { %1841 = shalt.err (!%p1838_p5)
}
 0x196   : > { %s1842_s29 = scalar_lea.hbm %s2201_s7, 2048  ;;  %s1846_s20 = scalar_lea.hbm %s2256_s3, 8192 }
 0x197   : > { %p1843_p9 = scmp.ne.s32.totalorder %s2201_s7, %s1842_s29  ;;  %p1847_p3 = scmp.lt.u32.totalorder %s2201_s7, %s2256_s3 }
 0x198   : > { %p1848_p7 = scmp.lt.u32.totalorder %s1846_s20, %s1842_s29  ;;  %p1850_p4 = scmp.lt.u32.totalorder %s1842_s29, %s2201_s7 }
 0x199   : > { %p1844_p1 = pnand %p1843_p9, %p2040_p11 }
 0x19a   : > { %p1849_p13 = por %p1848_p7, %p1847_p3 }
 0x19b   : > { %p1845_p2 = pneg %p1844_p1 }
 0x19c   : > { %p1851_p6 = por %p1850_p4, %p1849_p13 }
 0x19e   : > { %p1852_p8 = pnand %p1851_p6, %p1845_p2 }
 0x1a0   : > { %1855 = shalt.err (!%p1852_p8)
}
 0x1a1   : > { %s1923_s9 = smov 64   ;;  %s1924_s10 = smov 4  }
 0x1a2   : > { %1633 = dma.vmem_to_hbm [thread:$0]  (%p2040_p11), %s2203_s11, 2048, %s2201_s7, %s1140_s15, %s1923_s9, %s1923_s9, %s1924_s10  }
 0x1a3 PF: > { %p1650_p12 = scmp.ge.s32.totalorder %s1914_s17, 2  ;;  %s1169_s18 = sand.u32 1, %s1894_s12  }
 0x1a4   : > { %p2274_p10 = scmp.ne.s32.totalorder %s2264_s23, 0  ;;  %s1170_s26 = scalar_lea.sflag [#allocation5], %s1169_s18 }
 0x1a6   : > { %p1644_p0 = pnand %p1650_p12, %p2274_p10 }
 0x1a8   : > { %1889 = dma.done.wait (!%p1644_p0), %s1170_s26, 2048  }
 0x1a9   : > { %1891 = vsyncadd (!%p1644_p0), %s1170_s26, 4294965248  ;;  %s20_s17 = sadd.s32 1, %s1914_s17   ;;  %s2275_s12 = smov %s1898_s13 }
 0x1aa   : > { %p17_p5 = scmp.ge.s32.totalorder %s20_s17, 6   ;;  %s2276_s13 = smov %s1902_s14 }
 0x1ab   : > { %s2277_s14 = smov %s2049_s5  ;;  %s2278_s15 = smov %s1910_s16 }
 0x1ac   : > { %s2279_s16 = smov %s2281_s28  ;;  %19 = sbr.rel (!%p17_p5) target bundleno = 7 (0x7), region = 93 }
 0x1b3   :  { %1175 = vsyncpa [#allocation4], 1 }
 0x1b4   :  { %1177 = vsyncpa [#allocation4 + $0x1], 1 }
 0x1b5   :  { %1178 = vsyncpa [#allocation7], 1 }
 0x1b6   :  { %1179 = vsyncpa [#allocation5], 1 }
 0x1b7   :  { %1181 = vsyncpa [#allocation5 + $0x1], 1 }

</bundles_post_ra>
